<compile_context>
chip_gen: v7x
topology: tpu7x:2x2x1
jax: 0.10.0
libtpu: 0.0.40
codegen_flags: <defaults>
</compile_context>

<pallas_src>
import jax
import jax.numpy as jnp
from jax.experimental import pallas as pl
from jax.experimental.pallas import tpu as pltpu


_LANE = 128


def _sublane(itemsize):
    # sublane packing for the second-to-last dim: f32 -> 8, bf16 -> 16, int8 -> 32
    return {4: 8, 2: 16, 1: 32}.get(int(itemsize), 8)


def _vmem_capacity_bytes():
    try:
        return int(pltpu.get_tpu_info().vmem_capacity_bytes)
    except Exception:
        return 128 * 1024 * 1024  # v5e / v6e default


def _make_scalar_mix_kernel(R, L):
    """Kernel computing all R ScalarMix representations in one pass over L layer tiles."""

    def kernel(w_ref, mask_ref, *refs):
        # w_ref    : SMEM (R, L) f32       -- softmax(scalar_params) * gamma (pre-folded)
        # mask_ref : VMEM (TILE_T, 1) f32  -- binary mask tile (lane-padded in VMEM)
        # refs     : L x VMEM (TILE_T, D) inputs, then R x VMEM (TILE_T, D) outputs
        x_refs = refs[:L]
        o_refs = refs[L:]
        mask = mask_ref[...]                               # (TILE_T, 1), broadcasts over D
        accs = [None] * R
        for l in range(L):                                 # L tiny & static -> unrolled
            x_l = x_refs[l][...].astype(jnp.float32)       # stream each layer tile ONCE; f32 accumulate
            for r in range(R):
                term = w_ref[r, l] * x_l
                accs[r] = term if accs[r] is None else accs[r] + term
        for r in range(R):
            # mask applied once at the end (binary mask: mask*mask == mask)
            o_refs[r][...] = (accs[r] * mask).astype(o_refs[r].dtype)

    return kernel


def _choose_tile_t(B, T, L, D, R, in_item, out_item, vmem_budget_bytes):
    """Sequence-tile size: sublane-aligned, sized from a VMEM budget, >=2 grid steps."""
    sub = max(_sublane(in_item), _sublane(out_item))
    # per TILE_T row: double-buffered inputs (2*L) + double-buffered outputs (2*R)
    # + lane-padded mask block (f32, (tile_t,1) -> (tile_t,128), double-buffered).
    per_row = 2 * L * D * in_item + 2 * R * D * out_item + 2 * _LANE * 4
    tile = vmem_budget_bytes // max(per_row, 1)
    tile = max(sub, (tile // sub) * sub)                   # sublane-aligned
    tile = min(tile, 2048)                                 # keep pipeline depth reasonable
    if tile >= T:
        tile = T                                           # full-extent block always legal
    # v7x megacore: guarantee >= 2 grid iterations so both TensorCores get work.
    n_steps = B * ((T + tile - 1) // tile)
    if n_steps < 2 and T > sub:
        half = (T + 1) // 2
        half = ((half + sub - 1) // sub) * sub
        if half < T:
            tile = half
    return tile, per_row


def scalar_mix_with_mask_multi(layer_outputs, mask, weight_table, out_dtype=None):
    """Fused R-way ScalarMix + mask over L separate layer tensors (one HBM pass).

    layer_outputs: sequence of L arrays, each (B, T, D)   (f32 or bf16)
    mask:          (B, T) binary (float-castable)
    weight_table:  (R, L) f32, softmax weights with gamma already folded in
    Returns a tuple of R arrays of shape (B, T, D) in `out_dtype` (default: input dtype).
    """
    layer_outputs = tuple(layer_outputs)
    L = len(layer_outputs)
    B, T, D = layer_outputs[0].shape
    in_dtype = layer_outputs[0].dtype
    for x in layer_outputs:
        assert x.shape == (B, T, D) and x.dtype == in_dtype
    R = int(weight_table.shape[0])
    out_dtype = in_dtype if out_dtype is None else jnp.dtype(out_dtype)
    in_item = jnp.dtype(in_dtype).itemsize
    out_item = jnp.dtype(out_dtype).itemsize

    capacity = _vmem_capacity_bytes()
    # tiling budget: 16 MiB on v7x (64 MiB per-TC VMEM), 32 MiB on v5e/v6e (128 MiB)
    budget = min(capacity // 4, 32 * 1024 * 1024)
    tile_t, per_row = _choose_tile_t(B, T, L, D, R, in_item, out_item, budget)
    grid = (B, pl.cdiv(T, tile_t))

    # NOTE: single end-of-kernel mask application assumes a strictly binary {0,1} mask
    # (matches the PyTorch module, which multiplies by a binary mask twice).
    mask3 = mask.astype(jnp.float32)[..., None]            # (B, T, 1)

    kernel = _make_scalar_mix_kernel(R, L)
    out_shape = tuple(
        jax.ShapeDtypeStruct((B, T, D), out_dtype) for _ in range(R)
    )
    out_specs = tuple(
        pl.BlockSpec((None, tile_t, D), lambda b, t: (b, t, 0)) for _ in range(R)
    )

    in_specs = [
        # small (R, L) weight table: scalar reads from SMEM inside the kernel
        pl.BlockSpec(memory_space=pltpu.MemorySpace.SMEM),
        # mask tile; (tile_t, 1) block is lane-padded to (tile_t, 128) in VMEM
        pl.BlockSpec((None, tile_t, 1), lambda b, t: (b, t, 0)),
    ] + [
        # one (tile_t, D) slab per layer; batch dim squeezed out
        pl.BlockSpec((None, tile_t, D), lambda b, t: (b, t, 0)) for _ in range(L)
    ]

    # Explicit scoped-VMEM limit from the actual per-step double-buffered footprint.
    needed = tile_t * per_row
    vmem_cap = min(capacity // 2, 64 * 1024 * 1024)        # 32 MiB on v7x, 64 MiB on v5e/v6e
    vmem_limit = int(min(max(needed + (2 << 20), 16 << 20), vmem_cap))

    return pl.pallas_call(
        kernel,
        out_shape=out_shape,
        grid=grid,
        in_specs=in_specs,
        out_specs=out_specs,
        compiler_params=pltpu.CompilerParams(
            dimension_semantics=("parallel", "parallel"),
            vmem_limit_bytes=vmem_limit,
        ),
    )(weight_table, mask3, *layer_outputs)


class WeightedSumWrapperPallas:
    """JAX/Pallas port of WeightedSumWrapper for the config documented above."""

    def __init__(self, config, rnn_weights, num_output_representations=2, key=None,
                 mix_dtype=jnp.float32):
        self.config = config
        num_layers = config["rnn_layer"]["num_layers"]
        self.rnn_layer_type = config["rnn_layer"]["name"]
        self.dropout_rate = config["rnn_layer"]["dropout"]
        layer = num_layers
        if self.rnn_layer_type in ("transformer", "elmo"):
            layer += 1                                     # same bookkeeping as __init__
        self.layer = layer
        self.rnn_weights = rnn_weights
        # dtype used for streaming the layer outputs through the mix kernel
        # (bf16 halves HBM bytes; accumulation is always f32 inside the kernel).
        self.mix_dtype = jnp.dtype(mix_dtype)

        # ScalarMix parameters: `layer` scalar weights + gamma, per output representation.
        keys = jax.random.split(key, num_output_representations)
        self.scalar_mixes = []
        for k in range(num_output_representations):
            sp = 0.1 * jax.random.normal(keys[k], (layer,), jnp.float32)
            gamma = jnp.asarray(1.0 + 0.05 * k, jnp.float32)
            self.scalar_mixes.append((sp, gamma))

    def _get_all_layer_outputs(self, embedded, mask):
        # TODO(synk): the real `rnn` is an injected submodule (rnn.get_all_layer_output);
        # stubbed here as a deterministic per-layer tanh-linear stack (plain-JAX glue).
        # Returns a LIST of per-layer (B, T, D) tensors -- no (L,B,T,D) stack in HBM.
        outs = [embedded]
        h = embedded
        for (W, b) in self.rnn_weights:
            h = jnp.tanh(h @ W + b)
            outs.append(h)
        return outs

    def forward(self, embedded, mask):
        mask_f = mask.astype(jnp.float32)
        layer_list = self._get_all_layer_outputs(embedded, mask_f)   # L x (B, T, D)
        assert layer_list[0].ndim == 3 and len(layer_list) == self.layer
        if self.mix_dtype != layer_list[0].dtype:
            layer_list = [x.astype(self.mix_dtype) for x in layer_list]
        # Build (R, L) weight table on the host: softmax(scalar_params) * gamma.
        w_rows = [
            jax.nn.softmax(sp.astype(jnp.float32)) * jnp.asarray(g, jnp.float32)
            for (sp, g) in self.scalar_mixes
        ]
        weight_table = jnp.stack(w_rows, axis=0)
        # Single fused kernel: one HBM pass over all layer outputs, R masked reps out.
        reps = scalar_mix_with_mask_multi(layer_list, mask_f, weight_table)
        # nn.Dropout(p=0.0) == identity
        return list(reps)


if __name__ == "__main__":
    key = jax.random.PRNGKey(0)
    B, T, D = 2, 8, 128
    num_layers = 2
    k_emb, k_w, k_mix = jax.random.split(key, 3)

    embedded = jax.random.normal(k_emb, (B, T, D), jnp.float32)
    lengths = jnp.array([T, 5], jnp.int32)
    mask = (jnp.arange(T)[None, :] < lengths[:, None]).astype(jnp.int32)     # (B, T)

    wkeys = jax.random.split(k_w, num_layers * 2)
    rnn_weights = []
    for l in range(num_layers):
        W = jax.random.normal(wkeys[2 * l], (D, D), jnp.float32) / jnp.sqrt(D)
        b = 0.01 * jax.random.normal(wkeys[2 * l + 1], (D,), jnp.float32)
        rnn_weights.append((W, b))

    config = {
        "rnn_layer": {"num_layers": num_layers, "name": "transformer", "dropout": 0.0},
        "other_stuff": {},
    }

    # ---- f32 path (matches the PyTorch module's dtype exactly) ----
    model = WeightedSumWrapperPallas(config, rnn_weights,
                                     num_output_representations=2, key=k_mix)
    reps = jax.block_until_ready(model.forward(embedded, mask))

    # pure-JAX reference (original op order: mask before & after the mix)
    mask_f = mask.astype(jnp.float32)
    layer_list = model._get_all_layer_outputs(embedded, mask_f)
    outs = jnp.stack(layer_list, axis=0)                   # reference-only stack
    masked = outs * mask_f[None, :, :, None]
    for (sp, gamma), rep in zip(model.scalar_mixes, reps):
        w = jax.nn.softmax(sp)
        ref = gamma * jnp.einsum("l,lbtd->btd", w, masked) * mask_f[:, :, None]
        assert rep.shape == (B, T, D)
        assert jnp.allclose(rep, ref, rtol=1e-5, atol=1e-5)

    # ---- bf16 mix path (halved HBM traffic; f32 accumulation in-kernel) ----
    model_bf16 = WeightedSumWrapperPallas(config, rnn_weights,
                                          num_output_representations=2, key=k_mix,
                                          mix_dtype=jnp.bfloat16)
    reps_bf16 = jax.block_until_ready(model_bf16.forward(embedded, mask))
    masked_bf = outs.astype(jnp.bfloat16).astype(jnp.float32) * mask_f[None, :, :, None]
    for (sp, gamma), rep in zip(model_bf16.scalar_mixes, reps_bf16):
        w = jax.nn.softmax(sp)
        ref = gamma * jnp.einsum("l,lbtd->btd", w, masked_bf) * mask_f[:, :, None]
        assert rep.shape == (B, T, D) and rep.dtype == jnp.bfloat16
        assert jnp.allclose(rep.astype(jnp.float32), ref, rtol=2e-2, atol=2e-2)

    print("KERNEL_OK")
</pallas_src>

<mosaic_0001>
module attributes {stable_mosaic.version = 11 : i64} {
  func.func @kernel(%arg0: i32, %arg1: i32, %arg2: memref<2x3xf32, #tpu.memory_space<smem>>, %arg3: memref<1x8x1xf32, #tpu.memory_space<vmem>>, %arg4: memref<1x8x128xf32, #tpu.memory_space<vmem>>, %arg5: memref<1x8x128xf32, #tpu.memory_space<vmem>>, %arg6: memref<1x8x128xf32, #tpu.memory_space<vmem>>, %arg7: memref<1x8x128xf32, #tpu.memory_space<vmem>>, %arg8: memref<1x8x128xf32, #tpu.memory_space<vmem>>) attributes {dimension_semantics = [#tpu.dimension_semantics<parallel>, #tpu.dimension_semantics<parallel>], iteration_bounds = array<i64: 2, 1>, scalar_prefetch = 0 : i64, scratch_operands = 0 : i64, tpu.core_type = #tpu.core_type<tc>, window_params = [{transform_indices = @transform_0, window_bounds = array<i64: 2, 3>}, {transform_indices = @transform_1, window_bounds = array<i64: 1, 8, 1>}, {transform_indices = @transform_2, window_bounds = array<i64: 1, 8, 128>}, {transform_indices = @transform_3, window_bounds = array<i64: 1, 8, 128>}, {transform_indices = @transform_4, window_bounds = array<i64: 1, 8, 128>}, {transform_indices = @transform_5, window_bounds = array<i64: 1, 8, 128>}, {transform_indices = @transform_6, window_bounds = array<i64: 1, 8, 128>}]} {
    %c0 = arith.constant 0 : index
    %c0_0 = arith.constant 0 : index
    %c0_1 = arith.constant 0 : index
    %0 = vector.load %arg3[%c0, %c0_0, %c0_1] : memref<1x8x1xf32, #tpu.memory_space<vmem>>, vector<1x8x1xf32>
    %1 = vector.shape_cast %0 : vector<1x8x1xf32> to vector<8x1xf32>
    %c0_2 = arith.constant 0 : index
    %c0_3 = arith.constant 0 : index
    %c0_4 = arith.constant 0 : index
    %2 = vector.load %arg4[%c0_2, %c0_3, %c0_4] : memref<1x8x128xf32, #tpu.memory_space<vmem>>, vector<1x8x128xf32>
    %3 = vector.shape_cast %2 : vector<1x8x128xf32> to vector<8x128xf32>
    %c0_5 = arith.constant 0 : index
    %c0_6 = arith.constant 0 : index
    %4 = memref.load %arg2[%c0_5, %c0_6] : memref<2x3xf32, #tpu.memory_space<smem>>
    %5 = vector.broadcast %4 : f32 to vector<8x128xf32>
    %6 = arith.mulf %5, %3 : vector<8x128xf32>
    %c1 = arith.constant 1 : index
    %c0_7 = arith.constant 0 : index
    %7 = memref.load %arg2[%c1, %c0_7] : memref<2x3xf32, #tpu.memory_space<smem>>
    %8 = vector.broadcast %7 : f32 to vector<8x128xf32>
    %9 = arith.mulf %8, %3 : vector<8x128xf32>
    %c0_8 = arith.constant 0 : index
    %c0_9 = arith.constant 0 : index
    %c0_10 = arith.constant 0 : index
    %10 = vector.load %arg5[%c0_8, %c0_9, %c0_10] : memref<1x8x128xf32, #tpu.memory_space<vmem>>, vector<1x8x128xf32>
    %11 = vector.shape_cast %10 : vector<1x8x128xf32> to vector<8x128xf32>
    %c0_11 = arith.constant 0 : index
    %c1_12 = arith.constant 1 : index
    %12 = memref.load %arg2[%c0_11, %c1_12] : memref<2x3xf32, #tpu.memory_space<smem>>
    %13 = vector.broadcast %12 : f32 to vector<8x128xf32>
    %14 = arith.mulf %13, %11 : vector<8x128xf32>
    %15 = arith.addf %6, %14 : vector<8x128xf32>
    %c1_13 = arith.constant 1 : index
    %c1_14 = arith.constant 1 : index
    %16 = memref.load %arg2[%c1_13, %c1_14] : memref<2x3xf32, #tpu.memory_space<smem>>
    %17 = vector.broadcast %16 : f32 to vector<8x128xf32>
    %18 = arith.mulf %17, %11 : vector<8x128xf32>
    %19 = arith.addf %9, %18 : vector<8x128xf32>
    %c0_15 = arith.constant 0 : index
    %c0_16 = arith.constant 0 : index
    %c0_17 = arith.constant 0 : index
    %20 = vector.load %arg6[%c0_15, %c0_16, %c0_17] : memref<1x8x128xf32, #tpu.memory_space<vmem>>, vector<1x8x128xf32>
    %21 = vector.shape_cast %20 : vector<1x8x128xf32> to vector<8x128xf32>
    %c0_18 = arith.constant 0 : index
    %c2 = arith.constant 2 : index
    %22 = memref.load %arg2[%c0_18, %c2] : memref<2x3xf32, #tpu.memory_space<smem>>
    %23 = vector.broadcast %22 : f32 to vector<8x128xf32>
    %24 = arith.mulf %23, %21 : vector<8x128xf32>
    %25 = arith.addf %15, %24 : vector<8x128xf32>
    %c1_19 = arith.constant 1 : index
    %c2_20 = arith.constant 2 : index
    %26 = memref.load %arg2[%c1_19, %c2_20] : memref<2x3xf32, #tpu.memory_space<smem>>
    %27 = vector.broadcast %26 : f32 to vector<8x128xf32>
    %28 = arith.mulf %27, %21 : vector<8x128xf32>
    %29 = arith.addf %19, %28 : vector<8x128xf32>
    %30 = vector.broadcast %1 : vector<8x1xf32> to vector<8x128xf32>
    %31 = arith.mulf %25, %30 : vector<8x128xf32>
    %c0_21 = arith.constant 0 : index
    %c0_22 = arith.constant 0 : index
    %c0_23 = arith.constant 0 : index
    %32 = vector.load %arg7[%c0_21, %c0_22, %c0_23] : memref<1x8x128xf32, #tpu.memory_space<vmem>>, vector<1x8x128xf32>
    %33 = vector.shape_cast %32 : vector<1x8x128xf32> to vector<8x128xf32>
    %34 = vector.shape_cast %31 : vector<8x128xf32> to vector<1x8x128xf32>
    tpu.vector_store %arg7[%c0_21, %c0_22, %c0_23], %34 {strides = array<i32>} : memref<1x8x128xf32, #tpu.memory_space<vmem>>, vector<1x8x128xf32>,
    %35 = vector.broadcast %1 : vector<8x1xf32> to vector<8x128xf32>
    %36 = arith.mulf %29, %35 : vector<8x128xf32>
    %c0_24 = arith.constant 0 : index
    %c0_25 = arith.constant 0 : index
    %c0_26 = arith.constant 0 : index
    %37 = vector.load %arg8[%c0_24, %c0_25, %c0_26] : memref<1x8x128xf32, #tpu.memory_space<vmem>>, vector<1x8x128xf32>
    %38 = vector.shape_cast %37 : vector<1x8x128xf32> to vector<8x128xf32>
    %39 = vector.shape_cast %36 : vector<8x128xf32> to vector<1x8x128xf32>
    tpu.vector_store %arg8[%c0_24, %c0_25, %c0_26], %39 {strides = array<i32>} : memref<1x8x128xf32, #tpu.memory_space<vmem>>, vector<1x8x128xf32>,
    return
  }
  func.func @transform_0(%arg0: i32, %arg1: i32) -> (i32, i32) {
    %c0_i32 = arith.constant 0 : i32
    %c0_i32_0 = arith.constant 0 : i32
    %c0_i32_1 = arith.constant 0 : i32
    return %c0_i32, %c0_i32_0 : i32, i32
  }
  func.func @transform_1(%arg0: i32, %arg1: i32) -> (i32, i32, i32) {
    %c0_i32 = arith.constant 0 : i32
    %c0_i32_0 = arith.constant 0 : i32
    return %arg0, %arg1, %c0_i32 : i32, i32, i32
  }
  func.func @transform_2(%arg0: i32, %arg1: i32) -> (i32, i32, i32) {
    %c0_i32 = arith.constant 0 : i32
    %c0_i32_0 = arith.constant 0 : i32
    return %arg0, %arg1, %c0_i32 : i32, i32, i32
  }
  func.func @transform_3(%arg0: i32, %arg1: i32) -> (i32, i32, i32) {
    %c0_i32 = arith.constant 0 : i32
    %c0_i32_0 = arith.constant 0 : i32
    return %arg0, %arg1, %c0_i32 : i32, i32, i32
  }
  func.func @transform_4(%arg0: i32, %arg1: i32) -> (i32, i32, i32) {
    %c0_i32 = arith.constant 0 : i32
    %c0_i32_0 = arith.constant 0 : i32
    return %arg0, %arg1, %c0_i32 : i32, i32, i32
  }
  func.func @transform_5(%arg0: i32, %arg1: i32) -> (i32, i32, i32) {
    %c0_i32 = arith.constant 0 : i32
    %c0_i32_0 = arith.constant 0 : i32
    return %arg0, %arg1, %c0_i32 : i32, i32, i32
  }
  func.func @transform_6(%arg0: i32, %arg1: i32) -> (i32, i32, i32) {
    %c0_i32 = arith.constant 0 : i32
    %c0_i32_0 = arith.constant 0 : i32
    return %arg0, %arg1, %c0_i32 : i32, i32, i32
  }
}

</mosaic_0001>

<bundles_post_ra>
// kernel: tpu_custom_call.1
= control target key start
LH: loop header
LB: loop body
LE: loop exit
PB: predicated region body
PF: predicated region fallthrough
CT: control target
= control target key end

     0   :  { %s1212_s0 = inlined_call_operand.hbm [shape: f32[2,3], index: 0, kind: input, shape index: {}]   ;;  %s1213_s1 = inlined_call_operand.vmem [shape: f32[2,8,1], index: 1, kind: input, shape index: {}]   ;;  %s1214_s2 = inlined_call_operand.vmem [shape: f32[2,8,128], index: 2, kind: input, shape index: {}]   ;;  %s1215_s3 = inlined_call_operand.hbm [shape: f32[2,8,128], index: 3, kind: input, shape index: {}]   ;;  %s1216_s4 = inlined_call_operand.vmem [shape: f32[2,8,128], index: 4, kind: input, shape index: {}]   ;;  %s1217_s5 = inlined_call_operand.hbm [shape: f32[2,8,128], index: 5, kind: output, shape index: {0}]   ;;  %s1218_s6 = inlined_call_operand.hbm [shape: f32[2,8,128], index: 6, kind: output, shape index: {1}]  }
   0x1   :  { %1224 = sst [smem:[#allocation15_spill]] %s1212_s0 }
   0x2   :  { %1225 = sst [smem:[#allocation16_spill]] %s1215_s3 }
   0x3   :  { %12 = vsyncpa [#allocation5], 0 }
   0x4   :  { %13 = vsyncpa [#allocation3], 0 }
   0x5   :  { %15 = vsyncpa [#allocation3 + $0x1], 0 }
   0x6   :  { %16 = vsyncpa [#allocation4], 0 }
   0x7   :  { %18 = vsyncpa [#allocation4 + $0x1], 0 }
   0x8   :  { %19 = vsyncpa [#allocation9], 0 }
   0x9   :  { %21 = vsyncpa [#allocation9 + $0x1], 0  ;;  %s941_s21 = smov 0   ;;  %s943_s22 = smov 0  }
   0xa   :  { %s945_s23 = smov 0   ;;  %s947_s24 = smov 0  }
   0xb   :  { %s949_s25 = smov 0   ;;  %s951_s26 = smov 0  }
   0xc LB: > { %s632_s27 = sadd.s32 4294967295, %s899_s26   ;;  %s633_s28 = sadd.s32 4294967294, %s899_s26   ;;  %s899_s26 = sphi %s951_s26, %s27_s26   ;;  %s895_s25 = sphi %s949_s25, %s1249_s25   ;;  %s891_s24 = sphi %s947_s24, %s1248_s24   ;;  %s887_s23 = sphi %s945_s23, %s1247_s23   ;;  %s883_s22 = sphi %s943_s22, %s1246_s22   ;;  %s879_s21 = sphi %s941_s21, %s1245_s21  }
   0xd   : > { %p138_p0 = scmp.ne.s32.totalorder %s883_s22, %s879_s21  ;;  %p975_p1 = scmp.eq.s32.totalorder %s632_s27, 0 }
   0xe   : > { %p979_p2 = scmp.eq.s32.totalorder %s632_s27, 1  ;;  %p198_p3 = scmp.eq.s32.totalorder %s633_s28, 1 }
   0xf   : > { %s1226_s29 = scalar_select %p975_p1, 1, 0 }
  0x10   : > { %p985_p4 = por %p975_p1, %p138_p0  ;;  %p634_p5 = scmp.ge.s32.totalorder %s899_s26, 1 }
  0x11   : > { %p990_p6 = por %p198_p3, %p138_p0  ;;  %p233_p7 = scmp.lt.s32.totalorder %s899_s26, 3 }
  0x12   : > { %s1228_s7 = scalar_select %p985_p4, 1, 0 }
  0x13   : > { %s1229_s8 = scalar_select %p990_p6, 1, 0 }
  0x14   : > { %p995_p8 = pnand %p634_p5, %p233_p7  ;;  %s39_s10 = sadd.s32 1, %s895_s25 }
  0x15   : > { %p1009_p12 = scmp.ge.s32.totalorder %s39_s10, 2  ;;  %s125_s13 = sadd.s32 1, %s887_s23 }
  0x16   : > { %p668_p10 = pneg %p995_p8  ;;  %p132_p13 = scmp.ne.s32.totalorder %s887_s23, %s883_s22 }
  0x17   : > { %p133_p0 = scmp.eq.s32.totalorder %s899_s26, 0  ;;  %s1233_s0 = sld [smem:[#allocation15_spill]] }
  0x18   : > { %p1005_p11 = pnand %p668_p10, %p975_p1 }
  0x1a   : > { %p740_p5 = pneg %p1005_p11 }
  0x1d   : > { %s738_s16 = scalar_lea.hbm %s1233_s0, 32 }
  0x1e   : > { %p739_p3 = scmp.ne.s32.totalorder %s1233_s0, %s738_s16  ;;  %p745_p9 = scmp.lt.u32.totalorder %s738_s16, %s1233_s0 }
  0x20   : > { %p741_p7 = pnand %p740_p5, %p739_p3 }
  0x22   : > { %p742_p10 = pneg %p741_p7 }
  0x24   : > { %p747_p6 = pnand %p745_p9, %p742_p10 }
  0x26   : > { %750 = shalt.err (!%p747_p6)
}
  0x27   : > { %s901_s27 = smov [#allocation2]   ;;  %s1251_s10 = smov (%p1009_p12, %s39_s10), 0 }
  0x28   : > { %671 = dma.hbm_to_smem (!%p1005_p11), %s1233_s0, 32, %s901_s27, [#allocation5]  }
  0x29   : > { %1234 = sst [smem:[#allocation14_spill]] %s1251_s10  ;;  %p1040_p6 = por %p133_p0, %p132_p13 }
  0x2a   : > { %p1049_p9 = por %p979_p2, %p132_p13  ;;  %s120_s16 = ssub.s32 %s895_s25, %s1251_s10 }
  0x2b   : > { %p684_p3 = scmp.lt.s32.totalorder %s899_s26, 2  ;;  %p123_p5 = scmp.eq.s32.totalorder %s120_s16, 0 }
  0x2c   : > { %s1236_s15 = scalar_select %p1049_p9, 1, 0 }
  0x2d   : > { %s275_s17 = sand.u32 1, %s887_s23   ;;  %s638_s19 = sshll.u32 %s895_s25, 7 }
  0x2e   : > { %s637_s12 = sshll.u32 %s275_s17, 3  ;;  %s1237_s3 = sld [smem:[#allocation16_spill]] }
  0x2f   : > { %s1058_s18 = scalar_select %p123_p5, %s887_s23, %s125_s13  }
  0x30   : > { %s279_s30 = scalar_lea.vmem [#allocation6], %s637_s12  ;;  %p1070_p2 = pnand %p684_p3, %p1040_p6 }
  0x31   : > { %s287_s14 = sshll.u32 %s279_s30, 4  ;;  %s276_s13 = scalar_lea.sflag [#allocation3], %s275_s17  ;;  %s1066_s14 = int_to_ptr.vmem [resolvable:$true] %s287_s14 }
  0x32   : > { %p753_p12 = pneg %p1070_p2 }
  0x34   : > { %s1064_s28 = scalar_lea.hbm %s1237_s3, %s638_s19  ;;  %s756_s20 = scalar_lea.hbm %s1237_s3, 256 }
  0x35   : > { %s751_s0 = scalar_lea.hbm %s1064_s28, 128  ;;  %p757_p7 = scmp.lt.u32.totalorder %s1064_s28, %s1237_s3 }
  0x36   : > { %p752_p11 = scmp.ne.s32.totalorder %s1064_s28, %s751_s0  ;;  %p758_p10 = scmp.lt.u32.totalorder %s756_s20, %s751_s0 }
  0x37   : > { %p760_p3 = scmp.lt.u32.totalorder %s751_s0, %s1064_s28 }
  0x38   : > { %p754_p13 = pnand %p753_p12, %p752_p11  ;;  %p759_p6 = por %p758_p10, %p757_p7 }
  0x3a   : > { %p755_p0 = pneg %p754_p13  ;;  %p761_p5 = por %p760_p3, %p759_p6 }
  0x3c   : > { %p762_p9 = pnand %p761_p5, %p755_p0 }
  0x3e   : > { %765 = shalt.err (!%p762_p9)
}
  0x3f   : > { %s766_s17 = scalar_lea.vmem %s1066_s14, 128  ;;  %s902_s30 = smov [#allocation6]  }
  0x40   : > { %p767_p11 = scmp.ne.s32.totalorder %s1066_s14, %s766_s17  ;;  %s771_s12 = sshll.u32 %s902_s30, 4  ;;  %s772_s12 = int_to_ptr.vmem [resolvable:$false] %s771_s12 }
  0x41   : > { %s773_s19 = scalar_lea.vmem %s772_s12, 256  ;;  %p774_p1 = scmp.lt.s32.totalorder %s1066_s14, %s772_s12 }
  0x42   : > { %p769_p13 = pnand %p767_p11, %p753_p12  ;;  %p775_p7 = scmp.lt.s32.totalorder %s773_s19, %s766_s17 }
  0x44   : > { %p770_p4 = pneg %p769_p13  ;;  %p776_p10 = por %p775_p7, %p774_p1 }
  0x46   : > { %p777_p6 = pnand %p776_p10, %p770_p4 }
  0x48   : > { %780 = shalt.err (!%p777_p6)
}
  0x49   : > { %675 = dma.hbm_to_vmem [thread:$0]  (!%p1070_p2), %s1064_s28, 128, %s1066_s14, %s276_s13  }
  0x4a   : > { %306 = sbr.rel (%p995_p8) target bundleno = 262 (0x106), region = 40  ;;  %p1239_p9 = scmp.ne.s32.totalorder (!%p995_p8), %s1226_s29, 0 }
  0x51   : > { %862 = dma.done.wait (%p1239_p9), [#allocation5], 32  }
  0x52   : > { %864 = vsyncadd (%p1239_p9), [#allocation5], 4294967264  ;;  %s1106_s0 = sand.u32 1, %s883_s22   ;;  %p1240_p1 = scmp.ne.s32.totalorder %s1228_s7, 0 }
  0x53   : > { %s1109_s20 = sshll.u32 %s1106_s0, 3  ;;  %s313_s16 = scalar_lea.sflag [#allocation3], %s1106_s0 }
  0x54   : > { %s316_s28 = scalar_lea.vmem [#allocation6], %s1109_s20 }
  0x55   : > { %866 = dma.done.wait (%p1240_p1), %s313_s16, 128  }
  0x56   : > { %868 = vsyncadd (%p1240_p1), %s313_s16, 4294967168 }
  0x57   : > { %321 = sfence }
  0x58   : > { %p372_p4 = scmp.lt.s32.totalorder %s891_s24, 1  ;;  %v903_v0 = vmov 0   ;;  %s395_s27 = sld [smem:[#allocation2]]  ;;  %v401_v3 = vld [vmem:[%s316_s28] sm:$0xff] }
  0x59   : > { %737 = vset.pattern.permute.xlu0 %v903_v0  ;;  %s647_s17 = sld [smem:[#allocation2 + $0x80]]  ;;  %s648_s30 = sld [smem:[#allocation2 + $0x1]] }
  0x5a   : > { %s373_s29 = scalar_select %p372_p4, %s891_s24, 1 }
  0x5b   : > { %s649_s12 = sld [smem:[#allocation2 + $0x81]]  ;;  %s650_s7 = sld [smem:[#allocation2 + $0x2]] }
  0x5c   : > { %s644_s9 = sshll.u32 %s373_s29, 3  ;;  %s651_s10 = sld [smem:[#allocation2 + $0x82]] }
  0x5d   : > { %s378_s11 = scalar_lea.vmem %s1213_s1, %s644_s9  ;;  %s385_s3 = scalar_lea.vmem %s1214_s2, %s644_s9 }
  0x5e   : > { %v393_v1 = vld [vmem:[%s378_s11] sm:$0xff]  ;;  %v396_v4 = vstv %s395_s27  ;;  %s392_s13 = scalar_lea.vmem %s1216_s4, %s644_s9  ;;  %s364_s28 = scalar_lea.vmem [#allocation7], %s1109_s20 }
  0x5f   : > { %421 = vperm.xlu0 %737, %v393_v1   ;;  %v394_v2 = vld [vmem:[%s385_s3] sm:$0xff]  ;;  %v399_v5 = vstv %s647_s17  ;;  %v403_v6 = vstv %s648_s30  ;;  %s654_s3 = sshll.u32 %s891_s24, 7  ;;  %s448_s11 = sshll.u32 %s364_s28, 4  ;;  %s1136_s11 = int_to_ptr.vmem [resolvable:$true] %s448_s11 }
  0x60   : > { %v397_v8 = vmul.f32 %v396_v4, %v394_v2  ;;  %v400_v9 = vmul.f32 %v399_v5, %v394_v2  ;;  %v404_v10 = vmul.f32 %v403_v6, %v401_v3  ;;  %v410_v12 = vld [vmem:[%s392_s13] sm:$0xff]  ;;  %s371_s9 = scalar_lea.vmem [#allocation8], %s1109_s20  ;;  %s1141_s24 = scalar_lea.hbm %s1218_s6, %s654_s3 }
  0x61   : > { %v407_v7 = vstv %s649_s12  ;;  %v412_v13 = vstv %s650_s7  ;;  %s462_s27 = sshll.u32 %s371_s9, 4  ;;  %s1134_s12 = scalar_lea.hbm %s1217_s5, %s654_s3  ;;  %s1143_s27 = int_to_ptr.vmem [resolvable:$true] %s462_s27 }
  0x62   : > { %v408_v11 = vmul.f32 %v407_v7, %v401_v3  ;;  %v416_v14 = vstv %s651_s10  ;;  %v405_v15 = vadd.f32 %v404_v10, %v397_v8  ;;  %v413_v17 = vmul.f32 %v412_v13, %v410_v12  ;;  %s429_s20 = scalar_lea.sflag [#allocation4], %s1106_s0  ;;  %s781_s19 = scalar_lea.vmem %s1136_s11, 128 }
  0x63   : > { %v417_v18 = vmul.f32 %v416_v14, %v410_v12  ;;  %p782_p8 = scmp.ne.s32.totalorder %s1136_s11, %s781_s19  ;;  %p1241_p2 = scmp.ne.s32.totalorder %s1236_s15, 0 }
  0x64   : > { %v409_v16 = vadd.f32 %v408_v11, %v400_v9  ;;  %v414_v19 = vadd.f32 %v413_v17, %v405_v15  ;;  %s904_s16 = smov [#allocation7]  }
  0x65   : > { %p783_p12 = pnand %p782_p8, %p1241_p2  ;;  %s785_s29 = sshll.u32 %s904_s16, 4  ;;  %s786_s29 = int_to_ptr.vmem [resolvable:$false] %s785_s29 }
  0x66   : > { %v418_v20 = vadd.f32 %v417_v18, %v409_v16  ;;  %s787_s14 = scalar_lea.vmem %s786_s29, 256  ;;  %p788_p3 = scmp.lt.s32.totalorder %s1136_s11, %s786_s29 }
  0x67   : > { %p784_p0 = pneg %p783_p12  ;;  %p789_p5 = scmp.lt.s32.totalorder %s787_s14, %s781_s19 }
  0x69   : > { %p790_p11 = por %p789_p5, %p788_p3 }
  0x6b   : > { %p791_p13 = pnand %p790_p11, %p784_p0 }
  0xde   : > { %v422_v21 = vpop.permute.xlu0 %421 }
  0xdf   : > { %v424_v22 = vmul.f32 %v422_v21, %v414_v19  ;;  %v426_v23 = vmul.f32 %v422_v21, %v418_v20 }
  0xe1   : > { %425 = vst [vmem:[%s364_s28] sm:$0xff] %v424_v22  ;;  %427 = vst [vmem:[%s371_s9] sm:$0xff] %v426_v23 }
  0xe2   : > { %794 = shalt.err (!%p791_p13)
}
  0xe3   : > { %s795_s13 = scalar_lea.hbm %s1134_s12, 128  ;;  %s799_s9 = scalar_lea.hbm %s1217_s5, 256 }
  0xe4   : > { %p796_p7 = scmp.ne.s32.totalorder %s1134_s12, %s795_s13  ;;  %p800_p9 = scmp.lt.u32.totalorder %s1134_s12, %s1217_s5 }
  0xe5   : > { %p801_p1 = scmp.lt.u32.totalorder %s799_s9, %s795_s13  ;;  %p803_p8 = scmp.lt.u32.totalorder %s795_s13, %s1134_s12 }
  0xe6   : > { %p797_p10 = pnand %p796_p7, %p1241_p2 }
  0xe7   : > { %p802_p4 = por %p801_p1, %p800_p9 }
  0xe8   : > { %p798_p6 = pneg %p797_p10 }
  0xe9   : > { %p804_p12 = por %p803_p8, %p802_p4 }
  0xeb   : > { %p805_p0 = pnand %p804_p12, %p798_p6 }
  0xed   : > { %808 = shalt.err (!%p805_p0)
}
  0xee   : > { %664 = dma.vmem_to_hbm [thread:$0]  (%p1241_p2), %s1136_s11, 128, %s1134_s12, %s429_s20  }
  0xef   : > { %s434_s10 = scalar_lea.sflag [#allocation9], %s1106_s0  ;;  %s809_s7 = scalar_lea.vmem %s1143_s27, 128 }
  0xf0   : > { %p810_p3 = scmp.ne.s32.totalorder %s1143_s27, %s809_s7  ;;  %s905_s19 = smov [#allocation8]  }
  0xf1   : > { %s813_s16 = sshll.u32 %s905_s19, 4  ;;  %s814_s16 = int_to_ptr.vmem [resolvable:$false] %s813_s16 }
  0xf2   : > { %p811_p5 = pnand %p810_p3, %p1241_p2  ;;  %s815_s29 = scalar_lea.vmem %s814_s16, 256 }
  0xf3   : > { %p816_p13 = scmp.lt.s32.totalorder %s1143_s27, %s814_s16  ;;  %p817_p7 = scmp.lt.s32.totalorder %s815_s29, %s809_s7 }
  0xf4   : > { %p812_p11 = pneg %p811_p5 }
  0xf5   : > { %p818_p10 = por %p817_p7, %p816_p13 }
  0xf7   : > { %p819_p6 = pnand %p818_p10, %p812_p11 }
  0xf9   : > { %822 = shalt.err (!%p819_p6)
}
  0xfa   : > { %s823_s0 = scalar_lea.hbm %s1141_s24, 128  ;;  %s827_s20 = scalar_lea.hbm %s1218_s6, 256 }
  0xfb   : > { %p824_p9 = scmp.ne.s32.totalorder %s1141_s24, %s823_s0  ;;  %p828_p8 = scmp.lt.u32.totalorder %s1141_s24, %s1218_s6 }
  0xfc   : > { %p829_p12 = scmp.lt.u32.totalorder %s827_s20, %s823_s0  ;;  %p831_p3 = scmp.lt.u32.totalorder %s823_s0, %s1141_s24 }
  0xfd   : > { %p825_p1 = pnand %p824_p9, %p1241_p2 }
  0xfe   : > { %p830_p0 = por %p829_p12, %p828_p8 }
  0xff   : > { %p826_p4 = pneg %p825_p1 }
 0x100   : > { %p832_p5 = por %p831_p3, %p830_p0 }
 0x102   : > { %p833_p11 = pnand %p832_p5, %p826_p4 }
 0x104   : > { %836 = shalt.err (!%p833_p11)
}
 0x105   : > { %665 = dma.vmem_to_hbm [thread:$0]  (%p1241_p2), %s1143_s27, 128, %s1141_s24, %s434_s10  }
 0x106 PF: > { %s474_s3 = sand.u32 1, %s879_s21   ;;  %p1242_p13 = scmp.ne.s32.totalorder %s1229_s8, 0 }
 0x107   : > { %p1243_p7 = scmp.ge.s32.totalorder %s899_s26, 2  ;;  %s475_s28 = scalar_lea.sflag [#allocation4], %s474_s3 }
 0x109   : > { %p677_p10 = pnand %p1243_p7, %p1242_p13 }
 0x10b   : > { %870 = dma.done.wait (!%p677_p10), %s475_s28, 128  }
 0x10c   : > { %872 = vsyncadd (!%p677_p10), %s475_s28, 4294967168  ;;  %s484_s9 = scalar_lea.sflag [#allocation9], %s474_s3 }
 0x10d   : > { %874 = dma.done.wait (!%p677_p10), %s484_s9, 128  }
 0x10e   : > { %876 = vsyncadd (!%p677_p10), %s484_s9, 4294967168  ;;  %s27_s26 = sadd.s32 1, %s899_s26   ;;  %s1244_s15 = sld [smem:[#allocation14_spill]] }
 0x10f   : > { %p24_p6 = scmp.ge.s32.totalorder %s27_s26, 4   ;;  %s1245_s21 = smov %s883_s22 }
 0x110   : > { %s1246_s22 = smov %s887_s23  ;;  %s1247_s23 = smov %s1058_s18 }
 0x111   : > { %s1248_s24 = smov %s895_s25  ;;  %26 = sbr.rel (!%p24_p6) target bundleno = 12 (0xc), region = 116 }
 0x114   : > { %s1249_s25 = smov %s1244_s15 }
 0x118   :  { %489 = vsyncpa [#allocation3], 1 }
 0x119   :  { %491 = vsyncpa [#allocation3 + $0x1], 1 }
 0x11a   :  { %492 = vsyncpa [#allocation4], 1 }
 0x11b   :  { %494 = vsyncpa [#allocation4 + $0x1], 1 }
 0x11c   :  { %495 = vsyncpa [#allocation9], 1 }
 0x11d   :  { %497 = vsyncpa [#allocation9 + $0x1], 1 }
 0x11e   :  { %498 = vsyncpa [#allocation5], 1 }
 0x11f   :  { %500 = vsyncpa [#allocation5 + $0x1], 1 }

</bundles_post_ra>
